<compile_context>
chip_gen: v6e
topology: v6e:2x2x1
jax: 0.10.0
libtpu: 0.0.40
codegen_flags: <defaults>
</compile_context>

<pallas_src>
import jax
import jax.numpy as jnp
import numpy as np
from jax.experimental import pallas as pl
from jax.experimental.pallas import tpu as pltpu

SCALE = 4  # fixed by the module: scale_factor=4


def _upsample_kernel(x_ref, rep_ref, o_ref):
    # x_ref:   (R_BLK, T_BLK)          input tile
    # rep_ref: (T_BLK, SCALE*T_BLK)    one-hot replication matrix (constant block)
    # o_ref:   (R_BLK, SCALE*T_BLK)    lane-dense output tile
    x = x_ref[...].astype(jnp.float32)
    y = jnp.dot(x, rep_ref[...], preferred_element_type=jnp.float32)
    o_ref[...] = y.astype(o_ref.dtype)


def upsample_nearest_x4(x, *, row_block=None, t_block=None):
    """Nearest-neighbour x4 upsample along the last axis of (N, C, T)."""
    N, C, T = x.shape
    rows = N * C
    x2 = x.reshape(rows, T)  # free, contiguous reshape: (N*C, T)

    # ---- tiling choices ----------------------------------------------------
    # Time tile: lane-dense (128) when T divides, otherwise full-T blocks
    # (block dims must be multiples of (8, 128) or equal the full array dim).
    if t_block is None:
        t_block = 128 if (T % 128 == 0 and T >= 128) else T
    assert T % t_block == 0, "T must be a multiple of the time tile"

    # Row tile: cap so per-step VMEM stays small (fits v7x 32 MiB scoped easily),
    # pad rows with zeros if needed so the grid divides evenly.
    if row_block is None:
        row_block = rows if rows <= 256 else 256
    rows_pad = -(-rows // row_block) * row_block
    if rows_pad != rows:
        x2 = jnp.pad(x2, ((0, rows_pad - rows), (0, 0)))

    # One-hot replication matrix: rep[t, j] = 1 iff j // SCALE == t  (exact in f32).
    cols = jnp.arange(SCALE * t_block)
    rep = (cols[None, :] // SCALE == jnp.arange(t_block)[:, None]).astype(jnp.float32)

    grid = (rows_pad // row_block, T // t_block)

    out = pl.pallas_call(
        _upsample_kernel,
        out_shape=jax.ShapeDtypeStruct((rows_pad, SCALE * T), x.dtype),
        grid_spec=pltpu.PrefetchScalarGridSpec(
            num_scalar_prefetch=0,
            grid=grid,
            in_specs=[
                # input tile follows both grid axes
                pl.BlockSpec((row_block, t_block), lambda i, j: (i, j)),
                # replication matrix: same (tiny) block every step -> fetched once
                pl.BlockSpec((t_block, SCALE * t_block), lambda i, j: (0, 0)),
            ],
            out_specs=pl.BlockSpec((row_block, SCALE * t_block), lambda i, j: (i, j)),
        ),
        compiler_params=pltpu.CompilerParams(
            dimension_semantics=("parallel", "parallel")),
    )(x2, rep)

    return out[:rows].reshape(N, C, SCALE * T)


def upsample_reference(x):
    """Pure-JAX reference for F.interpolate(x, scale_factor=4, mode='nearest') on (N,C,T)."""
    return jnp.repeat(x, SCALE, axis=-1)


if __name__ == "__main__":
    N, C, T = 2, 8, 256

    key = jax.random.PRNGKey(0)
    x = jax.random.normal(key, (N, C, T), dtype=jnp.float32)

    # row_block=8 exercises both grid axes: grid = (2, 2)
    out = jax.block_until_ready(upsample_nearest_x4(x, row_block=8))
    ref = jax.block_until_ready(upsample_reference(x))

    assert out.shape == (N, C, SCALE * T), out.shape
    assert np.allclose(np.asarray(out), np.asarray(ref), atol=1e-6, rtol=0), (
        float(np.max(np.abs(np.asarray(out) - np.asarray(ref)))))
    print("KERNEL_OK")
</pallas_src>

<mosaic_0001>
module attributes {stable_mosaic.version = 11 : i64} {
  func.func @_upsample_kernel(%arg0: i32, %arg1: i32, %arg2: memref<8x128xf32, #tpu.memory_space<vmem>>, %arg3: memref<128x512xf32, #tpu.memory_space<vmem>>, %arg4: memref<8x512xf32, #tpu.memory_space<vmem>>) attributes {dimension_semantics = [#tpu.dimension_semantics<parallel>, #tpu.dimension_semantics<parallel>], iteration_bounds = array<i64: 2, 2>, scalar_prefetch = 0 : i64, scratch_operands = 0 : i64, tpu.core_type = #tpu.core_type<tc>, window_params = [{transform_indices = @transform_0, window_bounds = array<i64: 8, 128>}, {pipeline_mode = #tpu.pipeline_mode<synchronous>, transform_indices = @transform_1, window_bounds = array<i64: 128, 512>}, {transform_indices = @transform_2, window_bounds = array<i64: 8, 512>}]} {
    %c0 = arith.constant 0 : index
    %c0_0 = arith.constant 0 : index
    %0 = vector.load %arg2[%c0, %c0_0] : memref<8x128xf32, #tpu.memory_space<vmem>>, vector<8x128xf32>
    %c0_1 = arith.constant 0 : index
    %c0_2 = arith.constant 0 : index
    %1 = vector.load %arg3[%c0_1, %c0_2] : memref<128x512xf32, #tpu.memory_space<vmem>>, vector<128x512xf32>
    %cst = arith.constant dense<0.000000e+00> : vector<8x512xf32>
    %2 = tpu.matmul %0, %1, %cst {dimension_numbers = #tpu.dot_dimension_numbers<[1], [0], [0], [1], [0, 0, 1, 1], [], []>} : vector<8x128xf32>, vector<128x512xf32>, vector<8x512xf32> -> vector<8x512xf32>
    %c0_3 = arith.constant 0 : index
    %c0_4 = arith.constant 0 : index
    %3 = vector.load %arg4[%c0_3, %c0_4] : memref<8x512xf32, #tpu.memory_space<vmem>>, vector<8x512xf32>
    tpu.vector_store %arg4[%c0_3, %c0_4], %2 {strides = array<i32>} : memref<8x512xf32, #tpu.memory_space<vmem>>, vector<8x512xf32>,
    return
  }
  func.func @transform_0(%arg0: i32, %arg1: i32) -> (i32, i32) {
    %c0_i32 = arith.constant 0 : i32
    return %arg0, %arg1 : i32, i32
  }
  func.func @transform_1(%arg0: i32, %arg1: i32) -> (i32, i32) {
    %c0_i32 = arith.constant 0 : i32
    %c0_i32_0 = arith.constant 0 : i32
    %c0_i32_1 = arith.constant 0 : i32
    return %c0_i32, %c0_i32_0 : i32, i32
  }
  func.func @transform_2(%arg0: i32, %arg1: i32) -> (i32, i32) {
    %c0_i32 = arith.constant 0 : i32
    return %arg0, %arg1 : i32, i32
  }
}

</mosaic_0001>

<bundles_post_ra>
// kernel: tpu_custom_call.1
= control target key start
LH: loop header
LB: loop body
LE: loop exit
PB: predicated region body
PF: predicated region fallthrough
CT: control target
= control target key end

     0   :  { %s1003_s0 = inlined_call_operand.hbm [shape: f32[16,256], index: 0, kind: input, shape index: {}]   ;;  %s1004_s1 = inlined_call_operand.hbm [shape: f32[128,512], index: 1, kind: input, shape index: {}]   ;;  %s1005_s2 = inlined_call_operand.hbm [shape: f32[16,1024], index: 2, kind: output, shape index: {}]  }
   0x1   :  { %1010 = sst [smem:[#allocation14_spill]] %s1004_s1 }
   0x2   :  { %7 = vsyncpa [#allocation3], 0 }
   0x3   :  { %9 = vsyncpa [#allocation3 + $0x1], 0 }
   0x4   :  { %10 = vsyncpa [#allocation6], 0 }
   0x5   :  { %11 = vsyncpa [#allocation4], 0 }
   0x6   :  { %13 = vsyncpa [#allocation4 + $0x1], 0  ;;  %s804_s9 = smov 0   ;;  %s806_s10 = smov 0  }
   0x7   :  { %s808_s11 = smov 0   ;;  %s810_s12 = smov 0  }
   0x8   :  { %s812_s13 = smov 0   ;;  %s814_s14 = smov 0  }
   0x9   :  { %s816_s15 = smov 0   ;;  %s818_s16 = smov 0  }
   0xa LB: > { %1011 = sst [smem:[#allocation11_spill]] %s753_s9  ;;  %s517_s17 = sadd.s32 4294967295, %s781_s16   ;;  %s781_s16 = sphi %s818_s16, %s19_s16   ;;  %s777_s15 = sphi %s816_s15, %s1034_s15   ;;  %s773_s14 = sphi %s814_s14, %s1033_s14   ;;  %s769_s13 = sphi %s812_s13, %s1032_s13   ;;  %s765_s12 = sphi %s810_s12, %s1031_s12   ;;  %s761_s11 = sphi %s808_s11, %s1030_s11   ;;  %s757_s10 = sphi %s806_s10, %s1029_s10   ;;  %s753_s9 = sphi %s804_s9, %s1028_s9  }
   0xb   : > { %s518_s18 = sadd.s32 4294967294, %s781_s16   ;;  %p53_p0 = scmp.ne.s32.totalorder %s757_s10, %s753_s9 }
   0xc   : > { %p848_p1 = scmp.eq.s32.totalorder %s517_s17, 0  ;;  %p852_p2 = scmp.eq.s32.totalorder %s517_s17, 3 }
   0xd   : > { %p106_p3 = scmp.eq.s32.totalorder %s518_s18, 3  ;;  %p519_p5 = scmp.ge.s32.totalorder %s781_s16, 1 }
   0xe   : > { %p858_p4 = por %p848_p1, %p53_p0  ;;  %p113_p7 = scmp.lt.s32.totalorder %s781_s16, 5 }
   0xf   : > { %p863_p6 = por %p106_p3, %p53_p0  ;;  %s783_s24 = smov [#allocation5]  }
  0x10   : > { %s1014_s21 = scalar_select %p858_p4, 1, 0 }
  0x11   : > { %s1015_s22 = scalar_select %p863_p6, 1, 0 }
  0x12   : > { %p868_p8 = pnand %p519_p5, %p113_p7  ;;  %s125_s25 = sshll.u32 %s783_s24, 4  ;;  %s126_s25 = int_to_ptr.vmem [resolvable:$true] %s125_s25 }
  0x13   : > { %1016 = sst [smem:[#allocation12_spill]] %s1015_s22  ;;  %s638_s26 = scalar_lea.vmem %s126_s25, 8192 }
  0x14   : > { %p543_p9 = pneg %p868_p8  ;;  %p639_p12 = scmp.ne.s32.totalorder %s126_s25, %s638_s26 }
  0x15   : > { %p646_p3 = scmp.lt.s32.totalorder %s126_s25, %s126_s25  ;;  %p647_p6 = scmp.lt.s32.totalorder %s638_s26, %s638_s26 }
  0x16   : > { %p544_p10 = pnand %p543_p9, %p848_p1 }
  0x17   : > { %p648_p4 = por %p647_p6, %p646_p3 }
  0x18   : > { %p629_p11 = pneg %p544_p10 }
  0x1a   : > { %p641_p13 = pnand %p639_p12, %p629_p11 }
  0x1c   : > { %p642_p0 = pneg %p641_p13 }
  0x1e   : > { %p649_p5 = pnand %p648_p4, %p642_p0 }
  0x20   : > { %652 = shalt.err (!%p649_p5)
}
  0x21   : > { %s784_s27 = smov 512   ;;  %s785_s28 = smov 32  }
  0x22   : > { %s1018_s1 = sld [smem:[#allocation14_spill]]  ;;  %s28_s3 = sadd.s32 1, %s773_s14 }
  0x23   : > { %p29_p4 = scmp.ge.s32.totalorder %s28_s3, 2  ;;  %s31_s4 = sadd.s32 1, %s777_s15 }
  0x24   : > { %s40_s5 = sadd.s32 1, %s761_s11  ;;  %p47_p6 = scmp.ne.s32.totalorder %s761_s11, %s757_s10 }
  0x25   : > { %s1036_s3 = smov (%p29_p4, %s28_s3), 0  ;;  %s1038_s4 = smov (!%p29_p4, %s31_s4), %s777_s15 }
  0x26   : > { %1019 = sst [smem:[#allocation13_spill]] %s1036_s3  ;;  %s36_s6 = ssub.s32 %s773_s14, %s1036_s3 }
  0x27   : > { %p48_p7 = scmp.eq.s32.totalorder %s781_s16, 0  ;;  %p33_p9 = scmp.ge.s32.totalorder %s1038_s4, 2 }
  0x28   : > { %546 = dma.hbm_to_vmem [thread:$0]  (!%p544_p10), %s1018_s1, 8192, %s126_s25, [#allocation6], %s784_s27, %s784_s27, %s785_s28  }
  0x29   : > { %p892_p11 = por %p852_p2, %p47_p6  ;;  %p896_p10 = por %p48_p7, %p47_p6 }
  0x2a   : > { %p556_p12 = scmp.lt.s32.totalorder %s781_s16, 4  ;;  %s1040_s4 = smov (%p33_p9, %s1038_s4), 0 }
  0x2b   : > { %s139_s17 = sand.u32 1, %s761_s11   ;;  %s523_s18 = sshll.u32 %s777_s15, 1 }
  0x2c   : > { %s35_s24 = ssub.s32 %s777_s15, %s1040_s4  ;;  %s522_s26 = sshll.u32 %s139_s17, 3 }
  0x2d   : > { %s37_s25 = sor.u32 %s36_s6, %s35_s24  ;;  %s148_s20 = sadd.s32 %s773_s14, %s523_s18 }
  0x2e   : > { %p38_p13 = scmp.eq.s32.totalorder %s37_s25, 0  ;;  %s143_s27 = scalar_lea.vmem [#allocation2], %s522_s26 }
  0x2f   : > { %s152_s28 = sshll.u32 %s143_s27, 4  ;;  %s524_s30 = sshll.u32 %s148_s20, 7  ;;  %s153_s28 = int_to_ptr.vmem [resolvable:$true] %s152_s28 }
  0x30   : > { %s909_s29 = scalar_select %p38_p13, %s761_s11, %s40_s5  }
  0x31   : > { %s150_s22 = scalar_lea.hbm %s1003_s0, %s524_s30  ;;  %p918_p2 = pnand %p556_p12, %p896_p10 }
  0x32   : > { %s140_s6 = scalar_lea.sflag [#allocation3], %s139_s17  ;;  %s666_s18 = scalar_lea.vmem %s153_s28, 128 }
  0x33   : > { %p655_p0 = pneg %p918_p2  ;;  %p667_p3 = scmp.ne.s32.totalorder %s153_s28, %s666_s18 }
  0x34   : > { %s786_s5 = smov [#allocation2]  }
  0x35   : > { %p669_p5 = pnand %p667_p3, %p655_p0  ;;  %s671_s24 = sshll.u32 %s786_s5, 4  ;;  %s672_s24 = int_to_ptr.vmem [resolvable:$false] %s671_s24 }
  0x36   : > { %s673_s25 = scalar_lea.vmem %s672_s24, 256  ;;  %p674_p6 = scmp.lt.s32.totalorder %s153_s28, %s672_s24 }
  0x37   : > { %p670_p4 = pneg %p669_p5  ;;  %p675_p7 = scmp.lt.s32.totalorder %s673_s25, %s666_s18 }
  0x39   : > { %p676_p9 = por %p675_p7, %p674_p6 }
  0x3b   : > { %p677_p13 = pnand %p676_p9, %p670_p4 }
  0x3d   : > { %680 = shalt.err (!%p677_p13)
}
  0x3e   : > { %550 = dma.hbm_to_vmem [thread:$0]  (!%p918_p2), %s150_s22, 128, %s153_s28, %s140_s6  }
  0x3f   : > { %161 = sbr.rel (%p868_p8) target bundleno = 313 (0x139), region = 28  ;;  %s929_s1 = sand.u32 (!%p868_p8), 1, %s757_s10  }
  0x40   : > { %s526_s3 = sshll.u32 (!%p868_p8), %s929_s1, 3  ;;  %s164_s8 = scalar_lea.sflag (!%p868_p8), [#allocation3], %s929_s1 }
  0x41   : > { %s933_s17 = scalar_lea.vmem (!%p868_p8), [#allocation2], %s526_s3  ;;  %p1023_p10 = scmp.ne.s32.totalorder (!%p868_p8), %s1014_s21, 0 }
  0x44   : > { %740 = dma.done.wait (%p1023_p10), %s164_s8, 128  }
  0x45   : > { %742 = vsyncadd (%p1023_p10), %s164_s8, 4294967168 }
  0x46   : > { %744 = dma.done.wait (%p848_p1), [#allocation6], 8192  }
  0x47   : > { %746 = vsyncadd (%p848_p1), [#allocation6], 4294959104  ;;  %v787_v0 = vmov 0.0   ;;  %v255_v1 = vld [vmem:[#allocation5 + $0x1e8] sm:$0xff]  ;;  %v257_v2 = vld [vmem:[#allocation5 + $0x1f8] sm:$0xff]  ;;  %s528_s9 = sshll.u32 %s929_s1, 5 }
  0x48   : > { %322 = vmatprep.mubr.f32.mxu0 %v787_v0  ;;  %393 = vmatprep.mubr.f32.mxu1 %v787_v0  ;;  %v254_v3 = vld [vmem:[#allocation5 + $0x1e0] sm:$0xff]  ;;  %v256_v4 = vld [vmem:[#allocation5 + $0x1f0] sm:$0xff]  ;;  %v251_v5 = vld [vmem:[#allocation5 + $0x1c8] sm:$0xff]  ;;  %s530_s19 = sshll.u32 %s765_s12, 2  ;;  %s531_s21 = sshll.u32 %s769_s13, 3 }
  0x49   : > { %258 = vmatprep.subr.mxu0 %v255_v1  ;;  %329 = vmatprep.subr.mxu1 %v257_v2  ;;  %v253_v6 = vld [vmem:[#allocation5 + $0x1d8] sm:$0xff]  ;;  %v250_v7 = vld [vmem:[#allocation5 + $0x1c0] sm:$0xff]  ;;  %v252_v8 = vld [vmem:[#allocation5 + $0x1d0] sm:$0xff]  ;;  %s417_s22 = sadd.s32 %s531_s21, %s530_s19  ;;  %s191_s23 = scalar_lea.vmem [#allocation7], %s528_s9 }
  0x4a   : > { %259 = vmatpush1.msra.mxu0 %v254_v3  ;;  %330 = vmatpush1.msra.mxu1 %v256_v4  ;;  %v247_v9 = vld [vmem:[#allocation5 + $0x1a8] sm:$0xff]  ;;  %v249_v10 = vld [vmem:[#allocation5 + $0x1b8] sm:$0xff]  ;;  %v246_v11 = vld [vmem:[#allocation5 + $0x1a0] sm:$0xff]  ;;  %s421_s26 = sshll.u32 %s191_s23, 4  ;;  %s532_s20 = sshll.u32 %s417_s22, 7  ;;  %s947_s26 = int_to_ptr.vmem [resolvable:$true] %s421_s26 }
  0x4b   : > { %260 = vmatprep.subr.mxu0 %v251_v5  ;;  %331 = vmatprep.subr.mxu1 %v253_v6  ;;  %v248_v12 = vld [vmem:[#allocation5 + $0x1b0] sm:$0xff]  ;;  %v243_v13 = vld [vmem:[#allocation5 + $0x188] sm:$0xff]  ;;  %v245_v14 = vld [vmem:[#allocation5 + $0x198] sm:$0xff]  ;;  %s952_s12 = scalar_lea.hbm %s1005_s2, %s532_s20  ;;  %s405_s13 = scalar_lea.sflag [#allocation4], %s929_s1 }
  0x4c   : > { %261 = vmatpush1.msra.mxu0 %v250_v7  ;;  %332 = vmatpush1.msra.mxu1 %v252_v8  ;;  %v242_v15 = vld [vmem:[#allocation5 + $0x180] sm:$0xff]  ;;  %v244_v16 = vld [vmem:[#allocation5 + $0x190] sm:$0xff]  ;;  %v239_v17 = vld [vmem:[#allocation5 + $0x168] sm:$0xff]  ;;  %s681_s30 = scalar_lea.vmem %s947_s26, 512  ;;  %s788_s6 = smov [#allocation7]  }
  0x4d   : > { %262 = vmatprep.subr.mxu0 %v247_v9  ;;  %333 = vmatprep.subr.mxu1 %v249_v10  ;;  %v241_v18 = vld [vmem:[#allocation5 + $0x178] sm:$0xff]  ;;  %v238_v19 = vld [vmem:[#allocation5 + $0x160] sm:$0xff]  ;;  %v240_v20 = vld [vmem:[#allocation5 + $0x170] sm:$0xff]  ;;  %p682_p1 = scmp.ne.s32.totalorder %s947_s26, %s681_s30  ;;  %s685_s18 = sshll.u32 %s788_s6, 4  ;;  %s686_s18 = int_to_ptr.vmem [resolvable:$false] %s685_s18 }
  0x4e   : > { %263 = vmatpush1.msra.mxu0 %v246_v11  ;;  %334 = vmatpush1.msra.mxu1 %v248_v12  ;;  %v235_v21 = vld [vmem:[#allocation5 + $0x148] sm:$0xff]  ;;  %v237_v22 = vld [vmem:[#allocation5 + $0x158] sm:$0xff]  ;;  %v234_v23 = vld [vmem:[#allocation5 + $0x140] sm:$0xff]  ;;  %s687_s5 = scalar_lea.vmem %s686_s18, 1024  ;;  %p688_p2 = scmp.lt.s32.totalorder %s947_s26, %s686_s18 }
  0x4f   : > { %264 = vmatprep.subr.mxu0 %v243_v13  ;;  %335 = vmatprep.subr.mxu1 %v245_v14  ;;  %v236_v24 = vld [vmem:[#allocation5 + $0x150] sm:$0xff]  ;;  %v231_v25 = vld [vmem:[#allocation5 + $0x128] sm:$0xff]  ;;  %v233_v26 = vld [vmem:[#allocation5 + $0x138] sm:$0xff]  ;;  %p683_p8 = pnand %p682_p1, %p892_p11  ;;  %p689_p0 = scmp.lt.s32.totalorder %s687_s5, %s681_s30 }
  0x50   : > { %265 = vmatpush1.msra.mxu0 %v242_v15  ;;  %336 = vmatpush1.msra.mxu1 %v244_v16  ;;  %v230_v27 = vld [vmem:[#allocation5 + $0x120] sm:$0xff]  ;;  %v232_v28 = vld [vmem:[#allocation5 + $0x130] sm:$0xff]  ;;  %v227_v29 = vld [vmem:[#allocation5 + $0x108] sm:$0xff] }
  0x51   : > { %266 = vmatprep.subr.mxu0 %v239_v17  ;;  %337 = vmatprep.subr.mxu1 %v241_v18  ;;  %v229_v30 = vld [vmem:[#allocation5 + $0x118] sm:$0xff]  ;;  %v226_v31 = vld [vmem:[#allocation5 + $0x100] sm:$0xff]  ;;  %v228_v32 = vld [vmem:[#allocation5 + $0x110] sm:$0xff]  ;;  %p684_p12 = pneg %p683_p8  ;;  %p690_p3 = por %p689_p0, %p688_p2 }
  0x52   : > { %267 = vmatpush1.msra.mxu0 %v238_v19  ;;  %338 = vmatpush1.msra.mxu1 %v240_v20  ;;  %v223_v33 = vld [vmem:[#allocation5 + $0xe8] sm:$0xff]  ;;  %v225_v34 = vld [vmem:[#allocation5 + $0xf8] sm:$0xff]  ;;  %v222_v35 = vld [vmem:[#allocation5 + $0xe0] sm:$0xff] }
  0x53   : > { %268 = vmatprep.subr.mxu0 %v235_v21  ;;  %339 = vmatprep.subr.mxu1 %v237_v22  ;;  %v224_v36 = vld [vmem:[#allocation5 + $0xf0] sm:$0xff]  ;;  %v219_v37 = vld [vmem:[#allocation5 + $0xc8] sm:$0xff]  ;;  %v221_v38 = vld [vmem:[#allocation5 + $0xd8] sm:$0xff]  ;;  %p691_p5 = pnand %p690_p3, %p684_p12 }
  0x54   : > { %269 = vmatpush1.msra.mxu0 %v234_v23  ;;  %340 = vmatpush1.msra.mxu1 %v236_v24  ;;  %v218_v39 = vld [vmem:[#allocation5 + $0xc0] sm:$0xff]  ;;  %v220_v40 = vld [vmem:[#allocation5 + $0xd0] sm:$0xff]  ;;  %v215_v41 = vld [vmem:[#allocation5 + $0xa8] sm:$0xff] }
  0x55   : > { %270 = vmatprep.subr.mxu0 %v231_v25  ;;  %341 = vmatprep.subr.mxu1 %v233_v26  ;;  %v217_v42 = vld [vmem:[#allocation5 + $0xb8] sm:$0xff]  ;;  %v214_v43 = vld [vmem:[#allocation5 + $0xa0] sm:$0xff]  ;;  %v216_v44 = vld [vmem:[#allocation5 + $0xb0] sm:$0xff] }
  0x56   : > { %271 = vmatpush1.msra.mxu0 %v230_v27  ;;  %342 = vmatpush1.msra.mxu1 %v232_v28  ;;  %v211_v45 = vld [vmem:[#allocation5 + $0x88] sm:$0xff]  ;;  %v213_v46 = vld [vmem:[#allocation5 + $0x98] sm:$0xff]  ;;  %v210_v47 = vld [vmem:[#allocation5 + $0x80] sm:$0xff] }
  0x57   : > { %272 = vmatprep.subr.mxu0 %v227_v29  ;;  %343 = vmatprep.subr.mxu1 %v229_v30  ;;  %v212_v48 = vld [vmem:[#allocation5 + $0x90] sm:$0xff]  ;;  %v207_v49 = vld [vmem:[#allocation5 + $0x68] sm:$0xff]  ;;  %v209_v50 = vld [vmem:[#allocation5 + $0x78] sm:$0xff] }
  0x58   : > { %273 = vmatpush1.msra.mxu0 %v226_v31  ;;  %344 = vmatpush1.msra.mxu1 %v228_v32  ;;  %v206_v51 = vld [vmem:[#allocation5 + $0x60] sm:$0xff]  ;;  %v208_v52 = vld [vmem:[#allocation5 + $0x70] sm:$0xff]  ;;  %v203_v53 = vld [vmem:[#allocation5 + $0x48] sm:$0xff] }
  0x59   : > { %274 = vmatprep.subr.mxu0 %v223_v33  ;;  %345 = vmatprep.subr.mxu1 %v225_v34  ;;  %v205_v54 = vld [vmem:[#allocation5 + $0x58] sm:$0xff]  ;;  %v202_v55 = vld [vmem:[#allocation5 + $0x40] sm:$0xff]  ;;  %v204_v56 = vld [vmem:[#allocation5 + $0x50] sm:$0xff] }
  0x5a   : > { %275 = vmatpush1.msra.mxu0 %v222_v35  ;;  %346 = vmatpush1.msra.mxu1 %v224_v36  ;;  %v199_v57 = vld [vmem:[#allocation5 + $0x28] sm:$0xff]  ;;  %v201_v58 = vld [vmem:[#allocation5 + $0x38] sm:$0xff]  ;;  %v198_v59 = vld [vmem:[#allocation5 + $0x20] sm:$0xff] }
  0x5b   : > { %276 = vmatprep.subr.mxu0 %v219_v37  ;;  %347 = vmatprep.subr.mxu1 %v221_v38  ;;  %v200_v60 = vld [vmem:[#allocation5 + $0x30] sm:$0xff]  ;;  %v195_v61 = vld [vmem:[#allocation5 + $0x8] sm:$0xff]  ;;  %v197_v62 = vld [vmem:[#allocation5 + $0x18] sm:$0xff] }
  0x5c   : > { %277 = vmatpush1.msra.mxu0 %v218_v39  ;;  %348 = vmatpush1.msra.mxu1 %v220_v40  ;;  %v194_v63 = vld [vmem:[#allocation5] sm:$0xff]  ;;  %v196_v0 = vld [vmem:[#allocation5 + $0x10] sm:$0xff] }
  0x5d   : > { %278 = vmatprep.subr.mxu0 %v215_v41  ;;  %349 = vmatprep.subr.mxu1 %v217_v42  ;;  %v193_v1 = vld [vmem:[%s933_s17] sm:$0xff] }
  0x5e   : > { %279 = vmatpush1.msra.mxu0 %v214_v43  ;;  %350 = vmatpush1.msra.mxu1 %v216_v44 }
  0x5f   : > { %280 = vmatprep.subr.mxu0 %v211_v45  ;;  %351 = vmatprep.subr.mxu1 %v213_v46 }
  0x60   : > { %281 = vmatpush1.msra.mxu0 %v210_v47  ;;  %352 = vmatpush1.msra.mxu1 %v212_v48 }
  0x61   : > { %282 = vmatprep.subr.mxu0 %v207_v49  ;;  %353 = vmatprep.subr.mxu1 %v209_v50 }
  0x62   : > { %283 = vmatpush1.msra.mxu0 %v206_v51  ;;  %354 = vmatpush1.msra.mxu1 %v208_v52 }
  0x63   : > { %284 = vmatprep.subr.mxu0 %v203_v53  ;;  %355 = vmatprep.subr.mxu1 %v205_v54 }
  0x64   : > { %285 = vmatpush1.msra.mxu0 %v202_v55  ;;  %356 = vmatpush1.msra.mxu1 %v204_v56 }
  0x65   : > { %286 = vmatprep.subr.mxu0 %v199_v57  ;;  %357 = vmatprep.subr.mxu1 %v201_v58 }
  0x66   : > { %287 = vmatpush1.msra.mxu0 %v198_v59  ;;  %358 = vmatpush1.msra.mxu1 %v200_v60 }
  0x67   : > { %288 = vmatprep.subr.mxu0 %v195_v61  ;;  %359 = vmatprep.subr.mxu1 %v197_v62 }
  0x68   : > { %289 = vmatpush1.msra.mxu0 %v194_v63  ;;  %360 = vmatpush1.msra.mxu1 %v196_v0 }
  0x69   : > { %323 = vmatmul.mubr.f32.vlgmr.msra.gmra.mxu0 %v193_v1  ;;  %394 = vmatmul.mubr.f32.vlgmr.msra.gmra.mxu1 %v193_v1 }
 0x129   : > { %v324_v2 = vpop.f32.mrf.mxu0  ;;  %v395_v3 = vpop.f32.mrf.mxu1 }
 0x12a   : > { %400 = vst [vmem:[%s191_s23] sm:$0xff] %v324_v2  ;;  %402 = vst [vmem:[%s191_s23 + $0x10] sm:$0xff] %v395_v3 }
 0x12b   : > { %v326_v4 = vpop.f32.mrf.mxu0  ;;  %v397_v5 = vpop.f32.mrf.mxu1 }
 0x12c   : > { %401 = vst [vmem:[%s191_s23 + $0x8] sm:$0xff] %v326_v4  ;;  %403 = vst [vmem:[%s191_s23 + $0x18] sm:$0xff] %v397_v5 }
 0x12d   : > { %694 = shalt.err (!%p691_p5)
}
 0x12e   : > { %s695_s24 = scalar_lea.hbm %s952_s12, 512  ;;  %s699_s3 = scalar_lea.hbm %s1005_s2, 2048 }
 0x12f   : > { %p696_p4 = scmp.ne.s32.totalorder %s952_s12, %s695_s24  ;;  %p700_p9 = scmp.lt.s32.totalorder %s952_s12, %s1005_s2 }
 0x130   : > { %p701_p13 = scmp.lt.s32.totalorder %s699_s3, %s695_s24 }
 0x131   : > { %p697_p6 = pnand %p696_p4, %p892_p11 }
 0x132   : > { %p702_p10 = por %p701_p13, %p700_p9 }
 0x133   : > { %p698_p7 = pneg %p697_p6 }
 0x135   : > { %p703_p1 = pnand %p702_p10, %p698_p7 }
 0x137   : > { %706 = shalt.err (!%p703_p1)
}
 0x138   : > { %541 = dma.vmem_to_hbm [thread:$0]  (%p892_p11), %s947_s26, 512, %s952_s12, %s405_s13  }
 0x139 PF: > { %s1024_s9 = sld [smem:[#allocation11_spill]]  ;;  %p558_p8 = scmp.ge.s32.totalorder %s781_s16, 2 }
 0x13a   : > { %s1025_s19 = sld [smem:[#allocation12_spill]] }
 0x13f   : > { %s433_s21 = sand.u32 1, %s1024_s9  }
 0x140   : > { %p1026_p12 = scmp.ne.s32.totalorder %s1025_s19, 0  ;;  %s434_s22 = scalar_lea.sflag [#allocation4], %s433_s21 }
 0x142   : > { %p552_p2 = pnand %p558_p8, %p1026_p12 }
 0x144   : > { %p553_p0 = pneg %p552_p2 }
 0x146   : > { %748 = dma.done.wait (%p553_p0), %s434_s22, 512  }
 0x147   : > { %750 = vsyncadd (%p553_p0), %s434_s22, 4294966784  ;;  %s19_s16 = sadd.s32 1, %s781_s16   ;;  %s1027_s7 = sld [smem:[#allocation13_spill]] }
 0x148   : > { %p16_p3 = scmp.ge.s32.totalorder %s19_s16, 6   ;;  %s1028_s9 = smov %s757_s10 }
 0x149   : > { %s1029_s10 = smov %s761_s11  ;;  %s1030_s11 = smov %s909_s29 }
 0x14a   : > { %s1031_s12 = smov %s773_s14  ;;  %s1032_s13 = smov %s777_s15 }
 0x14b   : > { %s1034_s15 = smov %s1040_s4  ;;  %18 = sbr.rel (!%p16_p3) target bundleno = 10 (0xa), region = 77 }
 0x14d   : > { %s1033_s14 = smov %s1027_s7 }
 0x150   :  { %439 = vsyncpa [#allocation3], 1 }
 0x151   :  { %441 = vsyncpa [#allocation3 + $0x1], 1 }
 0x152   :  { %442 = vsyncpa [#allocation6], 1 }
 0x153   :  { %443 = vsyncpa [#allocation4], 1 }
 0x154   :  { %445 = vsyncpa [#allocation4 + $0x1], 1 }

</bundles_post_ra>
